<compile_context>
chip_gen: v6e
topology: v6e:2x2x1
jax: 0.10.0
libtpu: 0.0.40
codegen_flags: <defaults>
</compile_context>

<pallas_src>
import math

import jax
import jax.numpy as jnp
from jax.experimental import pallas as pl
from jax.experimental.pallas import tpu as pltpu


_INV_SQRT2 = 1.0 / math.sqrt(2.0)


def _gelu_exact(x):
    # erf-based GELU: matches torch.nn.GELU() default (not tanh approx).
    return 0.5 * x * (1.0 + jax.lax.erf(x * _INV_SQRT2))


def _round_up(v, m):
    return (v + m - 1) // m * m


def _vmem_capacity_bytes():
    try:
        return int(pltpu.get_tpu_info().vmem_capacity_bytes)
    except Exception:
        return 64 << 20   # conservative default: v7x per-TensorCore VMEM


def _pad2(a, rows, cols, dtype):
    a = a.astype(dtype)
    if a.shape == (rows, cols):
        return a                       # no padding round-trip when aligned
    return jnp.zeros((rows, cols), dtype).at[:a.shape[0], :a.shape[1]].set(a)


def _pad_row(b, cols, dtype):
    b = b.astype(dtype).reshape(1, -1)
    if b.shape[1] == cols:
        return b
    return jnp.zeros((1, cols), dtype).at[:, :b.shape[1]].set(b)


# ----------------------------- kernels --------------------------------------

def _mlp_kernel_resident(x_ref, w1_ref, b1_ref, w2_ref, b2_ref, o_ref):
    # Whole hidden dim resident in VMEM: single fused pass, no accumulator.
    h = jnp.dot(x_ref[...], w1_ref[...], preferred_element_type=jnp.float32)
    h = _gelu_exact(h + b1_ref[...])
    y = jnp.dot(h.astype(w2_ref.dtype), w2_ref[...],
                preferred_element_type=jnp.float32)
    # Dropout(p=0.0) == identity (inference semantics).
    o_ref[...] = (y + b2_ref[...]).astype(o_ref.dtype)


def _mlp_kernel_chunked(x_ref, w1_ref, b1_ref, w2_ref, b2_ref, o_ref, acc_ref):
    k = pl.program_id(1)

    @pl.when(k == 0)
    def _():
        acc_ref[...] = jnp.zeros_like(acc_ref)

    # fc1 partial for this hidden chunk: (tm, in) @ (in, th) -> f32 on MXU.
    h = jnp.dot(x_ref[...], w1_ref[...], preferred_element_type=jnp.float32)
    # bias + exact GELU in f32 (once per (i, k) tile).
    h = _gelu_exact(h + b1_ref[...])
    # fc2 partial: (tm, th) @ (th, out), accumulated in f32 scratch.
    acc_ref[...] += jnp.dot(h.astype(w2_ref.dtype), w2_ref[...],
                            preferred_element_type=jnp.float32)

    @pl.when(k == pl.num_programs(1) - 1)
    def _():
        o_ref[...] = (acc_ref[...] + b2_ref[...]).astype(o_ref.dtype)


# ----------------------------- wrapper ---------------------------------------

def mlp_forward(x, w1, b1, w2, b2, *, tm=None, th=None,
                compute_dtype=jnp.bfloat16):
    """Pallas TPU forward of Mlp: y = fc2(GELU(fc1(x))).

    x : (..., in_features)
    w1: (in_features, hidden)    b1: (hidden,)
    w2: (hidden, out_features)   b2: (out_features,)
    compute_dtype: dtype fed to the MXU (default bf16); bias adds, GELU and
                   accumulation stay f32.  Pass jnp.float32 for exact parity.
    tm/th: optional tile overrides (rows / hidden chunk).  th < hidden forces
           the chunked kernel; otherwise the weight-resident kernel is used
           whenever the weights fit the VMEM budget.

    Note: this function is fully jit-compatible; the padding/cast of the
    weights folds into the caller's compiled graph and is skipped entirely
    when feature dims are already multiples of 128.
    """
    orig_dtype = x.dtype
    f32 = jnp.float32

    in_f = x.shape[-1]
    hid = w1.shape[1]
    out_f = w2.shape[1]
    assert w1.shape[0] == in_f and w2.shape[0] == hid
    assert b1.shape == (hid,) and b2.shape == (out_f,)
    lead = x.shape[:-1]

    xm = x.reshape(-1, in_f)
    m = xm.shape[0]

    # ---- padded geometry (feature dims lane-dense: multiples of 128) -------
    in_p = _round_up(in_f, 128)
    out_p = _round_up(out_f, 128)
    hid_p = _round_up(hid, 128)

    cbytes = jnp.dtype(compute_dtype).itemsize
    obytes = jnp.dtype(orig_dtype).itemsize

    cap = _vmem_capacity_bytes()
    budget = int(cap * 0.85)          # headroom for compiler temporaries

    def need_resident(tm_):
        return (2 * tm_ * in_p * cbytes            # x tile (double-buffered)
                + 2 * in_p * hid_p * cbytes        # w1 (resident, 2 bufs)
                + 2 * hid_p * out_p * cbytes       # w2 (resident, 2 bufs)
                + 2 * 8 * hid_p * 4                # b1
                + 2 * 8 * out_p * 4                # b2
                + 2 * tm_ * out_p * obytes         # out tile
                + tm_ * hid_p * (4 + cbytes)       # f32 h + bf16 cast
                + tm_ * out_p * 4)                 # f32 y before cast

    def need_chunked(tm_, th_):
        return (2 * tm_ * in_p * cbytes
                + 2 * in_p * th_ * cbytes
                + 2 * th_ * out_p * cbytes
                + 2 * 8 * th_ * 4
                + 2 * 8 * out_p * 4
                + 2 * tm_ * out_p * obytes
                + tm_ * out_p * 4                  # f32 accumulator scratch
                + tm_ * th_ * (4 + cbytes)         # f32 h + cast
                + tm_ * out_p * 4)                 # dot result before +=

    # ---- tile selection ------------------------------------------------------
    tm_cap = max(16, min(1024, _round_up(max(m, 1), 16)))
    tm_cands = [c for c in (1024, 512, 256, 128, 64, 32, 16) if c <= tm_cap]
    if not tm_cands:
        tm_cands = [tm_cap]
    if tm is not None:
        tm_cands = [max(16, min(_round_up(tm, 16), tm_cap))]

    th_cands = [t for t in (2048, 1024, 512, 256, 128) if t <= hid_p]
    if not th_cands:
        th_cands = [hid_p]
    force_chunked = (th is not None) and (_round_up(th, 128) < hid_p)
    if th is not None:
        th_cands = [min(max(128, _round_up(th, 128)), hid_p)]

    tm_sel, th_sel, use_resident = None, None, False
    if not force_chunked:
        for c in tm_cands:
            if need_resident(c) <= budget:
                tm_sel, use_resident = c, True
                break
    if not use_resident:
        for c in tm_cands:
            for t in th_cands:
                if need_chunked(c, t) <= budget:
                    tm_sel, th_sel = c, t
                    break
            if tm_sel is not None:
                break
        if tm_sel is None:            # fallback: smallest tiles, let it ride
            tm_sel, th_sel = tm_cands[-1], th_cands[-1]

    if use_resident:
        hid_pp = hid_p
        need = need_resident(tm_sel)
    else:
        hid_pp = _round_up(hid_p, th_sel)
        need = need_chunked(tm_sel, th_sel)

    m_p = _round_up(max(m, 1), tm_sel)

    # vmem limit clamped to the physical per-core capacity (v7x = 64 MiB).
    vmem_limit = int(min(max(need + (4 << 20), 32 << 20), cap))

    # ---- zero-padded / cast operands (no-op when already aligned) -----------
    xp = _pad2(xm, m_p, in_p, compute_dtype)
    w1p = _pad2(w1, in_p, hid_pp, compute_dtype)
    b1p = _pad_row(b1, hid_pp, f32)
    w2p = _pad2(w2, hid_pp, out_p, compute_dtype)
    b2p = _pad_row(b2, out_p, f32)

    # ---- cost estimate (actual streamed traffic) ----------------------------
    n_row_tiles = m_p // tm_sel
    w_elems = in_p * hid_pp + hid_pp * out_p
    w_bytes = w_elems * cbytes * (1 if use_resident else n_row_tiles)
    flops = 2 * m_p * w_elems
    bytes_accessed = int(m_p * in_p * cbytes + w_bytes
                         + (hid_pp + out_p) * 4 + m_p * out_p * obytes)
    cost = pl.CostEstimate(flops=flops, transcendentals=m_p * hid_pp,
                           bytes_accessed=bytes_accessed)

    if use_resident:
        out = pl.pallas_call(
            _mlp_kernel_resident,
            out_shape=jax.ShapeDtypeStruct((m_p, out_p), orig_dtype),
            grid_spec=pltpu.PrefetchScalarGridSpec(
                num_scalar_prefetch=0,
                grid=(n_row_tiles,),
                in_specs=[
                    pl.BlockSpec((tm_sel, in_p), lambda i: (i, 0)),   # x rows
                    pl.BlockSpec((in_p, hid_pp), lambda i: (0, 0)),   # w1 once
                    pl.BlockSpec((1, hid_pp), lambda i: (0, 0)),      # b1
                    pl.BlockSpec((hid_pp, out_p), lambda i: (0, 0)),  # w2 once
                    pl.BlockSpec((1, out_p), lambda i: (0, 0)),       # b2
                ],
                out_specs=pl.BlockSpec((tm_sel, out_p), lambda i: (i, 0)),
            ),
            compiler_params=pltpu.CompilerParams(
                dimension_semantics=("parallel",),
                vmem_limit_bytes=vmem_limit),
            cost_estimate=cost,
        )(xp, w1p, b1p, w2p, b2p)
    else:
        out = pl.pallas_call(
            _mlp_kernel_chunked,
            out_shape=jax.ShapeDtypeStruct((m_p, out_p), orig_dtype),
            grid_spec=pltpu.PrefetchScalarGridSpec(
                num_scalar_prefetch=0,
                grid=(n_row_tiles, hid_pp // th_sel),
                in_specs=[
                    pl.BlockSpec((tm_sel, in_p), lambda i, k: (i, 0)),   # x
                    pl.BlockSpec((in_p, th_sel), lambda i, k: (0, k)),   # w1
                    pl.BlockSpec((1, th_sel), lambda i, k: (0, k)),      # b1
                    pl.BlockSpec((th_sel, out_p), lambda i, k: (k, 0)),  # w2
                    pl.BlockSpec((1, out_p), lambda i, k: (0, 0)),       # b2
                ],
                out_specs=pl.BlockSpec((tm_sel, out_p), lambda i, k: (i, 0)),
                scratch_shapes=[pltpu.VMEM((tm_sel, out_p), jnp.float32)],
            ),
            compiler_params=pltpu.CompilerParams(
                dimension_semantics=("parallel", "arbitrary"),
                vmem_limit_bytes=vmem_limit),
            cost_estimate=cost,
        )(xp, w1p, b1p, w2p, b2p)

    return out[:m, :out_f].reshape(*lead, out_f)


# ----------------------------- test harness ----------------------------------

def init_mlp_params(key, in_features, hidden_features, out_features,
                    dtype=jnp.float32):
    """Deterministic init mimicking nn.Linear defaults (kaiming-uniform-ish).
    Weights are stored transposed relative to PyTorch's (out, in) layout."""
    k1, k2, k3, k4 = jax.random.split(key, 4)
    bound1 = 1.0 / math.sqrt(in_features)
    bound2 = 1.0 / math.sqrt(hidden_features)
    w1 = jax.random.uniform(k1, (in_features, hidden_features),
                            minval=-bound1, maxval=bound1, dtype=dtype)
    b1 = jax.random.uniform(k2, (hidden_features,),
                            minval=-bound1, maxval=bound1, dtype=dtype)
    w2 = jax.random.uniform(k3, (hidden_features, out_features),
                            minval=-bound2, maxval=bound2, dtype=dtype)
    b2 = jax.random.uniform(k4, (out_features,),
                            minval=-bound2, maxval=bound2, dtype=dtype)
    return w1, b1, w2, b2


def _reference(x, w1, b1, w2, b2):
    h = x @ w1 + b1
    h = 0.5 * h * (1.0 + jax.lax.erf(h * _INV_SQRT2))
    return h @ w2 + b2


if __name__ == "__main__":
    key = jax.random.PRNGKey(0)
    kx, kp, kx2, kp2 = jax.random.split(key, 4)

    # --- Test 1: module-sized shapes (B=2, S=8, in=32, hid=64, out=32),
    #             f32 compute, weight-resident kernel; exact parity ----------
    B, S, D_in, D_hid, D_out = 2, 8, 32, 64, 32
    x = jax.random.normal(kx, (B, S, D_in), dtype=jnp.float32)
    w1, b1, w2, b2 = init_mlp_params(kp, D_in, D_hid, D_out)
    y_ref = _reference(x, w1, b1, w2, b2)

    y = jax.block_until_ready(
        mlp_forward(x, w1, b1, w2, b2, compute_dtype=jnp.float32))
    assert y.shape == (B, S, D_out)
    assert jnp.allclose(y, y_ref, atol=1e-4, rtol=1e-4), \
        float(jnp.max(jnp.abs(y - y_ref)))

    # --- Test 2: default bf16 MXU path (f32 bias / GELU / accumulation) -----
    y_bf = jax.block_until_ready(mlp_forward(x, w1, b1, w2, b2))
    assert jnp.allclose(y_bf, y_ref, atol=3e-2, rtol=3e-2), \
        float(jnp.max(jnp.abs(y_bf - y_ref)))

    # --- Test 3: chunked kernel (2-D grid: rows + hidden), f32 compute ------
    B2, S2, Din2, Dhid2, Dout2 = 2, 256, 128, 512, 128
    x2 = jax.random.normal(kx2, (B2, S2, Din2), dtype=jnp.float32)
    p2 = init_mlp_params(kp2, Din2, Dhid2, Dout2)
    y2_ref = _reference(x2, *p2)
    y2 = jax.block_until_ready(
        mlp_forward(x2, *p2, tm=128, th=128, compute_dtype=jnp.float32))
    assert y2.shape == (B2, S2, Dout2)
    assert jnp.allclose(y2, y2_ref, atol=2e-3, rtol=2e-3), \
        float(jnp.max(jnp.abs(y2 - y2_ref)))

    # --- Test 4: chunked kernel, default bf16 compute ------------------------
    y3 = jax.block_until_ready(mlp_forward(x2, *p2, tm=128, th=128))
    assert jnp.allclose(y3, y2_ref, atol=8e-2, rtol=8e-2), \
        float(jnp.max(jnp.abs(y3 - y2_ref)))

    print("KERNEL_OK")
</pallas_src>

<mosaic_0001>
module attributes {stable_mosaic.version = 11 : i64} {
  func.func @_mlp_kernel_resident(%arg0: i32, %arg1: memref<16x128xf32, #tpu.memory_space<vmem>>, %arg2: memref<128x128xf32, #tpu.memory_space<vmem>>, %arg3: memref<1x128xf32, #tpu.memory_space<vmem>>, %arg4: memref<128x128xf32, #tpu.memory_space<vmem>>, %arg5: memref<1x128xf32, #tpu.memory_space<vmem>>, %arg6: memref<16x128xf32, #tpu.memory_space<vmem>>) attributes {dimension_semantics = [#tpu.dimension_semantics<parallel>], iteration_bounds = array<i64: 1>, scalar_prefetch = 0 : i64, scratch_operands = 0 : i64, tpu.core_type = #tpu.core_type<tc>, window_params = [{transform_indices = @transform_0, window_bounds = array<i64: 16, 128>}, {pipeline_mode = #tpu.pipeline_mode<synchronous>, transform_indices = @transform_1, window_bounds = array<i64: 128, 128>}, {pipeline_mode = #tpu.pipeline_mode<synchronous>, transform_indices = @transform_2, window_bounds = array<i64: 1, 128>}, {pipeline_mode = #tpu.pipeline_mode<synchronous>, transform_indices = @transform_3, window_bounds = array<i64: 128, 128>}, {pipeline_mode = #tpu.pipeline_mode<synchronous>, transform_indices = @transform_4, window_bounds = array<i64: 1, 128>}, {transform_indices = @transform_5, window_bounds = array<i64: 16, 128>}]} {
    %c0 = arith.constant 0 : index
    %c0_0 = arith.constant 0 : index
    %0 = vector.load %arg1[%c0, %c0_0] : memref<16x128xf32, #tpu.memory_space<vmem>>, vector<16x128xf32>
    %c0_1 = arith.constant 0 : index
    %c0_2 = arith.constant 0 : index
    %1 = vector.load %arg2[%c0_1, %c0_2] : memref<128x128xf32, #tpu.memory_space<vmem>>, vector<128x128xf32>
    %cst = arith.constant dense<0.000000e+00> : vector<16x128xf32>
    %2 = tpu.matmul %0, %1, %cst {dimension_numbers = #tpu.dot_dimension_numbers<[1], [0], [0], [1], [0, 0, 1, 1], [], []>} : vector<16x128xf32>, vector<128x128xf32>, vector<16x128xf32> -> vector<16x128xf32>
    %c0_3 = arith.constant 0 : index
    %c0_4 = arith.constant 0 : index
    %3 = vector.load %arg3[%c0_3, %c0_4] : memref<1x128xf32, #tpu.memory_space<vmem>>, vector<1x128xf32>
    %4 = vector.broadcast %3 : vector<1x128xf32> to vector<16x128xf32>
    %5 = arith.addf %2, %4 : vector<16x128xf32>
    %cst_5 = arith.constant 5.000000e-01 : f32
    %6 = vector.broadcast %cst_5 : f32 to vector<16x128xf32>
    %7 = arith.mulf %6, %5 : vector<16x128xf32>
    %cst_6 = arith.constant 0.707106769 : f32
    %8 = vector.broadcast %cst_6 : f32 to vector<16x128xf32>
    %9 = arith.mulf %5, %8 : vector<16x128xf32>
    %10 = math.erf %9 : vector<16x128xf32>
    %cst_7 = arith.constant 1.000000e+00 : f32
    %11 = vector.broadcast %cst_7 : f32 to vector<16x128xf32>
    %12 = arith.addf %11, %10 : vector<16x128xf32>
    %13 = arith.mulf %7, %12 : vector<16x128xf32>
    %c0_8 = arith.constant 0 : index
    %c0_9 = arith.constant 0 : index
    %14 = vector.load %arg4[%c0_8, %c0_9] : memref<128x128xf32, #tpu.memory_space<vmem>>, vector<128x128xf32>
    %cst_10 = arith.constant dense<0.000000e+00> : vector<16x128xf32>
    %15 = tpu.matmul %13, %14, %cst_10 {dimension_numbers = #tpu.dot_dimension_numbers<[1], [0], [0], [1], [0, 0, 1, 1], [], []>} : vector<16x128xf32>, vector<128x128xf32>, vector<16x128xf32> -> vector<16x128xf32>
    %c0_11 = arith.constant 0 : index
    %c0_12 = arith.constant 0 : index
    %16 = vector.load %arg5[%c0_11, %c0_12] : memref<1x128xf32, #tpu.memory_space<vmem>>, vector<1x128xf32>
    %17 = vector.broadcast %16 : vector<1x128xf32> to vector<16x128xf32>
    %18 = arith.addf %15, %17 : vector<16x128xf32>
    %c0_13 = arith.constant 0 : index
    %c0_14 = arith.constant 0 : index
    %19 = vector.load %arg6[%c0_13, %c0_14] : memref<16x128xf32, #tpu.memory_space<vmem>>, vector<16x128xf32>
    tpu.vector_store %arg6[%c0_13, %c0_14], %18 {strides = array<i32>} : memref<16x128xf32, #tpu.memory_space<vmem>>, vector<16x128xf32>,
    return
  }
  func.func @transform_0(%arg0: i32) -> (i32, i32) {
    %c0_i32 = arith.constant 0 : i32
    %c0_i32_0 = arith.constant 0 : i32
    return %arg0, %c0_i32 : i32, i32
  }
  func.func @transform_1(%arg0: i32) -> (i32, i32) {
    %c0_i32 = arith.constant 0 : i32
    %c0_i32_0 = arith.constant 0 : i32
    %c0_i32_1 = arith.constant 0 : i32
    return %c0_i32, %c0_i32_0 : i32, i32
  }
  func.func @transform_2(%arg0: i32) -> (i32, i32) {
    %c0_i32 = arith.constant 0 : i32
    %c0_i32_0 = arith.constant 0 : i32
    %c0_i32_1 = arith.constant 0 : i32
    return %c0_i32, %c0_i32_0 : i32, i32
  }
  func.func @transform_3(%arg0: i32) -> (i32, i32) {
    %c0_i32 = arith.constant 0 : i32
    %c0_i32_0 = arith.constant 0 : i32
    %c0_i32_1 = arith.constant 0 : i32
    return %c0_i32, %c0_i32_0 : i32, i32
  }
  func.func @transform_4(%arg0: i32) -> (i32, i32) {
    %c0_i32 = arith.constant 0 : i32
    %c0_i32_0 = arith.constant 0 : i32
    %c0_i32_1 = arith.constant 0 : i32
    return %c0_i32, %c0_i32_0 : i32, i32
  }
  func.func @transform_5(%arg0: i32) -> (i32, i32) {
    %c0_i32 = arith.constant 0 : i32
    %c0_i32_0 = arith.constant 0 : i32
    return %arg0, %c0_i32 : i32, i32
  }
}

</mosaic_0001>

<bundles_post_ra>
// kernel: tpu_custom_call.1
= control target key start
LH: loop header
LB: loop body
LE: loop exit
PB: predicated region body
PF: predicated region fallthrough
CT: control target
= control target key end

     0   :  { %10 = vsyncpa [#allocation3], 0  ;;  %s560_s0 = inlined_call_operand.hbm [shape: f32[16,128], index: 0, kind: input, shape index: {}]   ;;  %s561_s1 = inlined_call_operand.hbm [shape: f32[128,128], index: 1, kind: input, shape index: {}]   ;;  %s562_s2 = inlined_call_operand.vmem [shape: f32[1,128], index: 2, kind: input, shape index: {}]   ;;  %s563_s3 = inlined_call_operand.hbm [shape: f32[128,128], index: 3, kind: input, shape index: {}]   ;;  %s564_s4 = inlined_call_operand.vmem [shape: f32[1,128], index: 4, kind: input, shape index: {}]   ;;  %s565_s5 = inlined_call_operand.hbm [shape: f32[16,128], index: 5, kind: output, shape index: {}]  }
   0x1   :  { %11 = vsyncpa [#allocation6], 0 }
   0x2   :  { %12 = vsyncpa [#allocation4], 0  ;;  %s494_s18 = smov [#allocation5]   ;;  %s495_s20 = smov [#allocation2]  }
   0x3   :  { %s30_s19 = sshll.u32 %s494_s18, 4  ;;  %s18_s21 = sshll.u32 %s495_s20, 4  ;;  %s31_s19 = int_to_ptr.vmem [resolvable:$true] %s30_s19  ;;  %s19_s21 = int_to_ptr.vmem [resolvable:$true] %s18_s21 }
   0x4   :  { %s416_s22 = scalar_lea.vmem %s31_s19, 2048  ;;  %p421_p1 = scmp.lt.s32.totalorder %s31_s19, %s31_s19 }
   0x5   :  { %p417_p0 = scmp.ne.s32.totalorder %s31_s19, %s416_s22  ;;  %p422_p2 = scmp.lt.s32.totalorder %s416_s22, %s416_s22 }
   0x7   :  { %p423_p3 = por %p422_p2, %p421_p1 }
   0x9   :  { %p424_p4 = pnand %p423_p3, %p417_p0 }
   0xb   :  { %427 = shalt.err (!%p424_p4)
}
   0xc   :  { %s496_s23 = smov 128   ;;  %s497_s24 = smov 8  }
   0xd   :  { %36 = dma.hbm_to_vmem [thread:$0]  %s561_s1, 2048, %s31_s19, [#allocation6], %s496_s23, %s496_s23, %s497_s24  }
   0xe   :  { %s436_s27 = scalar_lea.vmem %s19_s21, 256  ;;  %p441_p6 = scmp.lt.s32.totalorder %s19_s21, %s19_s21 }
   0xf   :  { %p437_p5 = scmp.ne.s32.totalorder %s19_s21, %s436_s27  ;;  %p442_p7 = scmp.lt.s32.totalorder %s436_s27, %s436_s27 }
  0x11   :  { %p443_p8 = por %p442_p7, %p441_p6 }
  0x13   :  { %p444_p9 = pnand %p443_p8, %p437_p5 }
  0x15   :  { %447 = shalt.err (!%p444_p9)
}
  0x16   :  { %24 = dma.hbm_to_vmem [thread:$0]  %s560_s0, 256, %s19_s21, [#allocation3], %s496_s23, %s496_s23, %s497_s24  }
  0x17   :  { %s498_s30 = smov [#allocation7]  }
  0x18   :  { %s44_s6 = sshll.u32 %s498_s30, 4  ;;  %s45_s6 = int_to_ptr.vmem [resolvable:$true] %s44_s6 }
  0x19   :  { %s456_s7 = scalar_lea.vmem %s45_s6, 2048  ;;  %p461_p11 = scmp.lt.s32.totalorder %s45_s6, %s45_s6 }
  0x1a   :  { %p457_p10 = scmp.ne.s32.totalorder %s45_s6, %s456_s7  ;;  %p462_p12 = scmp.lt.s32.totalorder %s456_s7, %s456_s7 }
  0x1c   :  { %p463_p13 = por %p462_p12, %p461_p11 }
  0x1e   :  { %p464_p0 = pnand %p463_p13, %p457_p10 }
  0x20   :  { %467 = shalt.err (!%p464_p0)
}
  0x21   :  { %50 = dma.hbm_to_vmem [thread:$0]  %s563_s3, 2048, %s45_s6, [#allocation6], %s496_s23, %s496_s23, %s497_s24  }
  0x22   :  { %488 = dma.done.wait [#allocation3], 256  }
  0x23   :  { %489 = vsyncadd [#allocation3], 4294967040 }
  0x24   :  { %490 = dma.done.wait [#allocation6], 4096  }
  0x25   :  { %491 = vsyncadd [#allocation6], 4294963200  ;;  %v79_v0 = vld [vmem:[#allocation5 + $0x78] sm:$0xff]  ;;  %v78_v1 = vld [vmem:[#allocation5 + $0x70] sm:$0xff]  ;;  %s499_s10 = smov [#allocation8]  }
  0x26   :  { %328 = vmatprep.subr.mxu0 %v79_v0  ;;  %v77_v2 = vld [vmem:[#allocation5 + $0x68] sm:$0xff]  ;;  %v76_v3 = vld [vmem:[#allocation5 + $0x60] sm:$0xff]  ;;  %v62_v4 = vld [vmem:[#allocation2] sm:$0xff]  ;;  %s277_s11 = sshll.u32 %s499_s10, 4  ;;  %s278_s11 = int_to_ptr.vmem [resolvable:$true] %s277_s11 }
  0x27   :  { %329 = vmatpush3.msra.mxu0 %v79_v0  ;;  %v75_v5 = vld [vmem:[#allocation5 + $0x58] sm:$0xff]  ;;  %360 = vmatprep.mubr.f32.mxu0 %v62_v4  ;;  %v186_v7 = vld [vmem:[#allocation7 + $0x70] sm:$0xff]  ;;  %v185_v9 = vld [vmem:[#allocation7 + $0x68] sm:$0xff]  ;;  %s468_s12 = scalar_lea.vmem %s278_s11, 256  ;;  %p473_p2 = scmp.lt.s32.totalorder %s278_s11, %s278_s11 }
  0x28   :  { %330 = vmatprep.subr.mxu0 %v78_v1  ;;  %v187_v6 = vld [vmem:[#allocation7 + $0x78] sm:$0xff]  ;;  %v74_v8 = vld [vmem:[#allocation5 + $0x50] sm:$0xff]  ;;  %v73_v10 = vld [vmem:[#allocation5 + $0x48] sm:$0xff]  ;;  %p469_p1 = scmp.ne.s32.totalorder %s278_s11, %s468_s12  ;;  %p474_p3 = scmp.lt.s32.totalorder %s468_s12, %s468_s12 }
  0x29   :  { %331 = vmatpush3.msra.mxu0 %v78_v1  ;;  %363 = vmatprep.subr.mxu1 %v187_v6  ;;  %v72_v11 = vld [vmem:[#allocation5 + $0x40] sm:$0xff]  ;;  %v71_v12 = vld [vmem:[#allocation5 + $0x38] sm:$0xff]  ;;  %v70_v13 = vld [vmem:[#allocation5 + $0x30] sm:$0xff] }
  0x2a   :  { %332 = vmatprep.subr.mxu0 %v77_v2  ;;  %364 = vmatpush3.msra.mxu1 %v187_v6  ;;  %v69_v14 = vld [vmem:[#allocation5 + $0x28] sm:$0xff]  ;;  %v68_v15 = vld [vmem:[#allocation5 + $0x20] sm:$0xff]  ;;  %v67_v16 = vld [vmem:[#allocation5 + $0x18] sm:$0xff]  ;;  %p475_p4 = por %p474_p3, %p473_p2 }
  0x2b   :  { %333 = vmatpush3.msra.mxu0 %v77_v2  ;;  %365 = vmatprep.subr.mxu1 %v186_v7  ;;  %v66_v17 = vld [vmem:[#allocation5 + $0x10] sm:$0xff]  ;;  %v65_v18 = vld [vmem:[#allocation5 + $0x8] sm:$0xff]  ;;  %v64_v19 = vld [vmem:[#allocation5] sm:$0xff] }
  0x2c   :  { %334 = vmatprep.subr.mxu0 %v76_v3  ;;  %366 = vmatpush3.msra.mxu1 %v186_v7  ;;  %v63_v20 = vld [vmem:[#allocation2 + $0x8] sm:$0xff]  ;;  %v184_v21 = vld [vmem:[#allocation7 + $0x60] sm:$0xff]  ;;  %v182_v23 = vld [vmem:[#allocation7 + $0x50] sm:$0xff]  ;;  %p476_p5 = pnand %p475_p4, %p469_p1 }
  0x2d   :  { %335 = vmatpush3.msra.mxu0 %v76_v3  ;;  %367 = vmatprep.subr.mxu1 %v185_v9  ;;  %v183_v22 = vld [vmem:[#allocation7 + $0x58] sm:$0xff]  ;;  %v181_v24 = vld [vmem:[#allocation7 + $0x48] sm:$0xff]  ;;  %v180_v25 = vld [vmem:[#allocation7 + $0x40] sm:$0xff] }
  0x2e   :  { %336 = vmatprep.subr.mxu0 %v75_v5  ;;  %368 = vmatpush3.msra.mxu1 %v185_v9  ;;  %v179_v26 = vld [vmem:[#allocation7 + $0x38] sm:$0xff]  ;;  %v178_v27 = vld [vmem:[#allocation7 + $0x30] sm:$0xff]  ;;  %v177_v28 = vld [vmem:[#allocation7 + $0x28] sm:$0xff] }
  0x2f   :  { %337 = vmatpush3.msra.mxu0 %v75_v5  ;;  %369 = vmatprep.subr.mxu1 %v184_v21  ;;  %v176_v29 = vld [vmem:[#allocation7 + $0x20] sm:$0xff]  ;;  %v175_v30 = vld [vmem:[#allocation7 + $0x18] sm:$0xff]  ;;  %v174_v31 = vld [vmem:[#allocation7 + $0x10] sm:$0xff] }
  0x30   :  { %338 = vmatprep.subr.mxu0 %v74_v8  ;;  %370 = vmatpush3.msra.mxu1 %v184_v21  ;;  %v173_v32 = vld [vmem:[#allocation7 + $0x8] sm:$0xff]  ;;  %v172_v33 = vld [vmem:[#allocation7] sm:$0xff]  ;;  %v290_v34 = vld [vmem:[%s562_s2] ss:$0 sm:$0xff] }
  0x31   :  { %339 = vmatpush3.msra.mxu0 %v74_v8  ;;  %371 = vmatprep.subr.mxu1 %v183_v22  ;;  %v291_v49 = vld [vmem:[%s564_s4] ss:$0 sm:$0xff] }
  0x32   :  { %340 = vmatprep.subr.mxu0 %v73_v10  ;;  %372 = vmatpush3.msra.mxu1 %v183_v22 }
  0x33   :  { %341 = vmatpush3.msra.mxu0 %v73_v10  ;;  %373 = vmatprep.subr.mxu1 %v182_v23 }
  0x34   :  { %342 = vmatprep.subr.mxu0 %v72_v11  ;;  %374 = vmatpush3.msra.mxu1 %v182_v23 }
  0x35   :  { %343 = vmatpush3.msra.mxu0 %v72_v11  ;;  %375 = vmatprep.subr.mxu1 %v181_v24 }
  0x36   :  { %344 = vmatprep.subr.mxu0 %v71_v12  ;;  %376 = vmatpush3.msra.mxu1 %v181_v24 }
  0x37   :  { %345 = vmatpush3.msra.mxu0 %v71_v12  ;;  %377 = vmatprep.subr.mxu1 %v180_v25 }
  0x38   :  { %346 = vmatprep.subr.mxu0 %v70_v13  ;;  %378 = vmatpush3.msra.mxu1 %v180_v25 }
  0x39   :  { %347 = vmatpush3.msra.mxu0 %v70_v13  ;;  %379 = vmatprep.subr.mxu1 %v179_v26 }
  0x3a   :  { %348 = vmatprep.subr.mxu0 %v69_v14  ;;  %380 = vmatpush3.msra.mxu1 %v179_v26 }
  0x3b   :  { %349 = vmatpush3.msra.mxu0 %v69_v14  ;;  %381 = vmatprep.subr.mxu1 %v178_v27 }
  0x3c   :  { %350 = vmatprep.subr.mxu0 %v68_v15  ;;  %382 = vmatpush3.msra.mxu1 %v178_v27 }
  0x3d   :  { %351 = vmatpush3.msra.mxu0 %v68_v15  ;;  %383 = vmatprep.subr.mxu1 %v177_v28 }
  0x3e   :  { %352 = vmatprep.subr.mxu0 %v67_v16  ;;  %384 = vmatpush3.msra.mxu1 %v177_v28 }
  0x3f   :  { %353 = vmatpush3.msra.mxu0 %v67_v16  ;;  %385 = vmatprep.subr.mxu1 %v176_v29 }
  0x40   :  { %354 = vmatprep.subr.mxu0 %v66_v17  ;;  %386 = vmatpush3.msra.mxu1 %v176_v29 }
  0x41   :  { %355 = vmatpush3.msra.mxu0 %v66_v17  ;;  %387 = vmatprep.subr.mxu1 %v175_v30 }
  0x42   :  { %356 = vmatprep.subr.mxu0 %v65_v18  ;;  %388 = vmatpush3.msra.mxu1 %v175_v30 }
  0x43   :  { %357 = vmatpush3.msra.mxu0 %v65_v18  ;;  %389 = vmatprep.subr.mxu1 %v174_v31 }
  0x44   :  { %358 = vmatprep.subr.mxu0 %v64_v19  ;;  %390 = vmatpush3.msra.mxu1 %v174_v31 }
  0x45   :  { %359 = vmatpush3.msra.mxu0 %v64_v19  ;;  %391 = vmatprep.subr.mxu1 %v173_v32 }
  0x46   :  { %361 = vmatmul.mubr.f32.vlgmr.msra.gmra.mxu0 %v63_v20  ;;  %392 = vmatpush3.msra.mxu1 %v173_v32 }
  0x47   :  { %393 = vmatprep.subr.mxu1 %v172_v33 }
  0x48   :  { %394 = vmatpush3.msra.mxu1 %v172_v33 }
 0x106   :  { %v362_v35 = vpop.f32.mrf.mxu0 }
 0x107   :  { %v159_v36 = vadd.f32 %v362_v35, %v290_v34 }
 0x108   :  { %v153_v37 = vpop.f32.mrf.mxu0 }
 0x109   :  { %v165_v38 = vmul.f32 0.70710677, %v159_v36  ;;  %v154_v39 = vadd.f32 %v290_v34, %v153_v37  ;;  %v163_v46 = vmul.f32 0.5, %v159_v36 }
 0x10b   :  { %404 = verf.f32 %v165_v38  ;;  %v164_v40 = vmul.f32 0.70710677, %v154_v39  ;;  %v162_v44 = vmul.f32 0.5, %v154_v39 }
 0x10d   :  { %406 = verf.f32 %v164_v40 }
 0x118   :  { %v405_v41 = vpop.eup %404 }
 0x119   :  { %v169_v43 = vadd.f32 1.0, %v405_v41 }
 0x11a   :  { %v407_v42 = vpop.eup %406 }
 0x11b   :  { %v168_v45 = vadd.f32 1.0, %v407_v42  ;;  %v171_v48 = vmul.f32 %v169_v43, %v163_v46 }
 0x11d   :  { %v170_v47 = vmul.f32 %v168_v45, %v162_v44 }
 0x11f   :  { %395 = vmatprep.mubr.f32.mxu1 %v170_v47 }
 0x120   :  { %396 = vmatmul.mubr.f32.vlgmr.msra.gmra.mxu1 %v171_v48 }
 0x1e0   :  { %v397_v50 = vpop.f32.mrf.mxu1 }
 0x1e1   :  { %v267_v51 = vadd.f32 %v397_v50, %v291_v49 }
 0x1e2   :  { %v261_v52 = vpop.f32.mrf.mxu1 }
 0x1e3   :  { %271 = vst [vmem:[#allocation8 + $0x8] sm:$0xff] %v267_v51  ;;  %v262_v53 = vadd.f32 %v291_v49, %v261_v52 }
 0x1e5   :  { %270 = vst [vmem:[#allocation8] sm:$0xff] %v262_v53 }
 0x1e6   :  { %479 = shalt.err (!%p476_p5)
}
 0x1e7   :  { %283 = dma.vmem_to_hbm [thread:$0]  %s278_s11, 256, %s565_s5, [#allocation4], %s496_s23, %s496_s23, %s497_s24  }
 0x1e8   :  { %492 = dma.done.wait [#allocation4], 256  }
 0x1e9   :  { %493 = vsyncadd [#allocation4], 4294967040 }
 0x1ea   :  { %287 = vsyncpa [#allocation3], 1 }
 0x1eb   :  { %288 = vsyncpa [#allocation6], 1 }
 0x1ec   :  { %289 = vsyncpa [#allocation4], 1 }

</bundles_post_ra>
